<compile_context>
chip_gen: v7x
topology: tpu7x:2x2x1
jax: 0.10.0
libtpu: 0.0.40
codegen_flags: <defaults>
</compile_context>

<pallas_src>
import functools

import numpy as np
import jax
import jax.numpy as jnp
from jax.experimental import pallas as pl
from jax.experimental.pallas import tpu as pltpu

BIAS = 1.0                 # self.bias = 1 (scalar, broadcast over output channels)
ADD_CONST = 3.0            # the `v1 + 3`
LANE = 128
MAX_SUBLANE_TILE = 4096    # 4096 * 128 * 4 B = 2 MiB per channel plane per block
MAX_FLAT_TILE = MAX_SUBLANE_TILE * LANE
VMEM_LIMIT_BYTES = 48 * 1024 * 1024   # < 64 MiB (v7x physical); plenty on v5e/v6e
MIN_TOTAL_STEPS = 4        # keep megacore sharding + double-buffer pipeline busy


def _round_up(x: int, m: int) -> int:
    return ((x + m - 1) // m) * m


def _spatial_tile(S: int, N: int) -> int:
    """Sublane tile over the (HW // 128) spatial axis; multiple of 8 or == S."""
    if S <= 8:
        return S
    want_blocks = max(1, (MIN_TOTAL_STEPS + N - 1) // N)
    ts = _round_up((S + want_blocks - 1) // want_blocks, 8)
    return min(ts, MAX_SUBLANE_TILE)


def _flat_tile(HW: int, N: int) -> int:
    """Element tile over flat HW for the non-128-aligned fallback; multiple of 128."""
    want_blocks = max(1, (MIN_TOTAL_STEPS + N - 1) // N)
    blk = _round_up((HW + want_blocks - 1) // want_blocks, LANE)
    return max(LANE, min(blk, MAX_FLAT_TILE))


def _channel_mix(xs, w_rows, const, out_dtype):
    """Per-output-channel relu(sum_ci w[co,ci]*x_ci + const); dedups equal rows."""
    outs, cache = [], {}
    for row in w_rows:
        if row not in cache:
            acc = None
            for wv, xc in zip(row, xs):
                if wv == 0.0:
                    continue
                term = xc if wv == 1.0 else xc * wv
                acc = term if acc is None else acc + term
            if acc is None:
                acc = jnp.zeros_like(xs[0])
            cache[row] = jnp.maximum(acc + const, 0.0).astype(out_dtype)
        outs.append(cache[row])
    return outs


def _mix_kernel_tiled(x_ref, o_ref, *, w_rows, const):
    # x_ref: (1, Cin, ts, 128) VMEM; o_ref: (1, Cout, ts, 128) VMEM
    cin = len(w_rows[0])
    xs = [x_ref[0, ci] for ci in range(cin)]          # loads hoisted (once per block)
    outs = _channel_mix(xs, w_rows, const, o_ref.dtype)
    for co, v in enumerate(outs):
        o_ref[0, co] = v


def _mix_kernel_flat(x_ref, o_ref, *, w_rows, const):
    # x_ref: (1, Cin, blk) VMEM; o_ref: (1, Cout, blk) VMEM (blk % 128 == 0)
    cin = len(w_rows[0])
    xs = [x_ref[0, ci:ci + 1, :] for ci in range(cin)]  # keepdims -> (1, blk) 2-D
    outs = _channel_mix(xs, w_rows, const, o_ref.dtype)
    for co, v in enumerate(outs):
        o_ref[0, co:co + 1, :] = v


def _forward_impl(x_nchw, w_rows):
    N, Cin, H, W = x_nchw.shape
    Cout = len(w_rows)
    assert len(w_rows[0]) == Cin
    const = float(BIAS + ADD_CONST)            # fold conv bias and the +3
    HW = H * W
    dtype = x_nchw.dtype
    cp = pltpu.CompilerParams(
        dimension_semantics=("parallel", "parallel"),
        vmem_limit_bytes=VMEM_LIMIT_BYTES,
    )

    if HW % LANE == 0:
        # Fast path: lane- and sublane-dense layout, zero extra HBM copies.
        S = HW // LANE
        ts = _spatial_tile(S, N)
        x = x_nchw.reshape(N, Cin, S, LANE)    # contiguous reshape: free under jit
        out = pl.pallas_call(
            functools.partial(_mix_kernel_tiled, w_rows=w_rows, const=const),
            out_shape=jax.ShapeDtypeStruct((N, Cout, S, LANE), dtype),
            grid=(N, pl.cdiv(S, ts)),
            in_specs=[pl.BlockSpec((1, Cin, ts, LANE), lambda n, s: (n, 0, s, 0))],
            out_specs=pl.BlockSpec((1, Cout, ts, LANE), lambda n, s: (n, 0, s, 0)),
            compiler_params=cp,
        )(x)
        return out.reshape(N, Cout, H, W)

    # Fallback (HW not a multiple of 128): flat layout, Pallas masks the
    # partial trailing block -- no padded input copy, no output slice copy.
    x = x_nchw.reshape(N, Cin, HW)
    blk = _flat_tile(HW, N)
    out = pl.pallas_call(
        functools.partial(_mix_kernel_flat, w_rows=w_rows, const=const),
        out_shape=jax.ShapeDtypeStruct((N, Cout, HW), dtype),
        grid=(N, pl.cdiv(HW, blk)),
        in_specs=[pl.BlockSpec((1, Cin, blk), lambda n, s: (n, 0, s))],
        out_specs=pl.BlockSpec((1, Cout, blk), lambda n, s: (n, 0, s)),
        compiler_params=cp,
    )(x)
    return out.reshape(N, Cout, H, W)


def make_model_forward(weight):
    """Bake the module's constant (Cout, Cin) channel-mix weight into the kernel."""
    w = np.asarray(weight, dtype=np.float32)
    w_rows = tuple(tuple(float(v) for v in row) for row in w)

    @jax.jit
    def forward(x_nchw):
        return _forward_impl(x_nchw, w_rows)

    return forward


def reference_forward(x_nchw, weight):
    # pure-JAX reference: 1x1 conv (channel mix) + bias, +3, relu
    w = jnp.asarray(weight, dtype=jnp.float32)
    v1 = jnp.einsum("oc,nchw->nohw", w, x_nchw.astype(jnp.float32)) + BIAS
    v2 = v1 + ADD_CONST
    return jnp.maximum(v2, 0.0).astype(x_nchw.dtype)


if __name__ == "__main__":
    key = jax.random.PRNGKey(0)
    # The all-ones 3x3 channel-mixing weight from Model.__init__.
    weight = np.ones((3, 3), dtype=np.float32)
    forward = make_model_forward(weight)

    k1, k2, k3 = jax.random.split(key, 3)
    tests = [
        jax.random.normal(k1, (2, 3, 16, 16), dtype=jnp.float32),  # small, aligned
        jax.random.normal(k2, (1, 3, 64, 64), dtype=jnp.float32),  # spec shape
        jax.random.normal(k3, (1, 3, 7, 9), dtype=jnp.float32),    # non-128-aligned HW
    ]

    for x in tests:
        out = jax.block_until_ready(forward(x))
        ref = reference_forward(x, weight)
        assert out.shape == (x.shape[0], 3, x.shape[2], x.shape[3])
        assert jnp.allclose(out, ref, atol=1e-5, rtol=1e-5), (
            f"mismatch at shape {x.shape}: max err "
            f"{float(jnp.max(jnp.abs(out - ref)))}"
        )

    print("KERNEL_OK")
</pallas_src>

<mosaic_0001>
module attributes {stable_mosaic.version = 11 : i64} {
  func.func @_mix_kernel_tiled(%arg0: i32, %arg1: i32, %arg2: memref<1x3x2x128xf32, #tpu.memory_space<vmem>>, %arg3: memref<1x3x2x128xf32, #tpu.memory_space<vmem>>) attributes {dimension_semantics = [#tpu.dimension_semantics<parallel>, #tpu.dimension_semantics<parallel>], iteration_bounds = array<i64: 2, 1>, scalar_prefetch = 0 : i64, scratch_operands = 0 : i64, tpu.core_type = #tpu.core_type<tc>, window_params = [{transform_indices = @transform_0, window_bounds = array<i64: 1, 3, 2, 128>}, {transform_indices = @transform_1, window_bounds = array<i64: 1, 3, 2, 128>}]} {
    %c0 = arith.constant 0 : index
    %c0_0 = arith.constant 0 : index
    %c0_1 = arith.constant 0 : index
    %c0_2 = arith.constant 0 : index
    %0 = vector.load %arg2[%c0, %c0_0, %c0_1, %c0_2] : memref<1x3x2x128xf32, #tpu.memory_space<vmem>>, vector<1x1x2x128xf32>
    %1 = vector.shape_cast %0 : vector<1x1x2x128xf32> to vector<2x128xf32>
    %c0_3 = arith.constant 0 : index
    %c1 = arith.constant 1 : index
    %c0_4 = arith.constant 0 : index
    %c0_5 = arith.constant 0 : index
    %2 = vector.load %arg2[%c0_3, %c1, %c0_4, %c0_5] : memref<1x3x2x128xf32, #tpu.memory_space<vmem>>, vector<1x1x2x128xf32>
    %3 = vector.shape_cast %2 : vector<1x1x2x128xf32> to vector<2x128xf32>
    %c0_6 = arith.constant 0 : index
    %c2 = arith.constant 2 : index
    %c0_7 = arith.constant 0 : index
    %c0_8 = arith.constant 0 : index
    %4 = vector.load %arg2[%c0_6, %c2, %c0_7, %c0_8] : memref<1x3x2x128xf32, #tpu.memory_space<vmem>>, vector<1x1x2x128xf32>
    %5 = vector.shape_cast %4 : vector<1x1x2x128xf32> to vector<2x128xf32>
    %6 = arith.addf %1, %3 : vector<2x128xf32>
    %7 = arith.addf %6, %5 : vector<2x128xf32>
    %cst = arith.constant 4.000000e+00 : f32
    %8 = vector.broadcast %cst : f32 to vector<2x128xf32>
    %9 = arith.addf %7, %8 : vector<2x128xf32>
    %cst_9 = arith.constant 0.000000e+00 : f32
    %10 = vector.broadcast %cst_9 : f32 to vector<2x128xf32>
    %11 = arith.maximumf %9, %10 : vector<2x128xf32>
    %c0_10 = arith.constant 0 : index
    %c0_11 = arith.constant 0 : index
    %c0_12 = arith.constant 0 : index
    %c0_13 = arith.constant 0 : index
    %12 = vector.load %arg3[%c0_10, %c0_11, %c0_12, %c0_13] : memref<1x3x2x128xf32, #tpu.memory_space<vmem>>, vector<1x1x2x128xf32>
    %13 = vector.shape_cast %12 : vector<1x1x2x128xf32> to vector<2x128xf32>
    %14 = vector.shape_cast %11 : vector<2x128xf32> to vector<1x1x2x128xf32>
    tpu.vector_store %arg3[%c0_10, %c0_11, %c0_12, %c0_13], %14 {strides = array<i32>} : memref<1x3x2x128xf32, #tpu.memory_space<vmem>>, vector<1x1x2x128xf32>,
    %c0_14 = arith.constant 0 : index
    %c1_15 = arith.constant 1 : index
    %c0_16 = arith.constant 0 : index
    %c0_17 = arith.constant 0 : index
    %15 = vector.load %arg3[%c0_14, %c1_15, %c0_16, %c0_17] : memref<1x3x2x128xf32, #tpu.memory_space<vmem>>, vector<1x1x2x128xf32>
    %16 = vector.shape_cast %15 : vector<1x1x2x128xf32> to vector<2x128xf32>
    %17 = vector.shape_cast %11 : vector<2x128xf32> to vector<1x1x2x128xf32>
    tpu.vector_store %arg3[%c0_14, %c1_15, %c0_16, %c0_17], %17 {strides = array<i32>} : memref<1x3x2x128xf32, #tpu.memory_space<vmem>>, vector<1x1x2x128xf32>,
    %c0_18 = arith.constant 0 : index
    %c2_19 = arith.constant 2 : index
    %c0_20 = arith.constant 0 : index
    %c0_21 = arith.constant 0 : index
    %18 = vector.load %arg3[%c0_18, %c2_19, %c0_20, %c0_21] : memref<1x3x2x128xf32, #tpu.memory_space<vmem>>, vector<1x1x2x128xf32>
    %19 = vector.shape_cast %18 : vector<1x1x2x128xf32> to vector<2x128xf32>
    %20 = vector.shape_cast %11 : vector<2x128xf32> to vector<1x1x2x128xf32>
    tpu.vector_store %arg3[%c0_18, %c2_19, %c0_20, %c0_21], %20 {strides = array<i32>} : memref<1x3x2x128xf32, #tpu.memory_space<vmem>>, vector<1x1x2x128xf32>,
    return
  }
  func.func @transform_0(%arg0: i32, %arg1: i32) -> (i32, i32, i32, i32) {
    %c0_i32 = arith.constant 0 : i32
    %c0_i32_0 = arith.constant 0 : i32
    %c0_i32_1 = arith.constant 0 : i32
    return %arg0, %c0_i32, %arg1, %c0_i32_0 : i32, i32, i32, i32
  }
  func.func @transform_1(%arg0: i32, %arg1: i32) -> (i32, i32, i32, i32) {
    %c0_i32 = arith.constant 0 : i32
    %c0_i32_0 = arith.constant 0 : i32
    %c0_i32_1 = arith.constant 0 : i32
    return %arg0, %c0_i32, %arg1, %c0_i32_0 : i32, i32, i32, i32
  }
}

</mosaic_0001>

<bundles_post_ra>
// kernel: forward.1
= control target key start
LH: loop header
LB: loop body
LE: loop exit
PB: predicated region body
PF: predicated region fallthrough
CT: control target
= control target key end

     0   :  { %s317_s6 = smov 0   ;;  %s319_s7 = smov 0   ;;  %s338_s0 = inlined_call_operand.vmem [shape: f32[2,3,2,128], index: 0, kind: input, shape index: {}]   ;;  %s339_s1 = inlined_call_operand.vmem [shape: f32[2,3,2,128], index: 1, kind: output, shape index: {}]  }
   0x1   :  { %s321_s8 = smov 0  }
   0x2 LB: > { %s23_s9 = sadd.s32 1, %s301_s7  ;;  %p249_p0 = scmp.ge.s32.totalorder %s305_s8, 1  ;;  %s305_s8 = sphi %s321_s8, %s11_s8   ;;  %s301_s7 = sphi %s319_s7, %s341_s7   ;;  %s297_s6 = sphi %s317_s6, %s340_s6  }
   0x3   : > { %p25_p1 = scmp.ge.s32.totalorder %s23_s9, 2  ;;  %p106_p2 = scmp.lt.s32.totalorder %s305_s8, 3 }
   0x5   : > { %s343_s9 = smov (%p25_p1, %s23_s9), 0  ;;  %p107_p3 = pnand %p249_p0, %p106_p2 }
   0x6   : > { %p132_p4 = scmp.lt.s32.totalorder (!%p107_p3), %s297_s6, 1 }
   0x7   : > { %110 = sbr.rel (%p107_p3) target bundleno = 29 (0x1d), region = 24 }
   0xe   : > { %s345_s6 = smov (!%p132_p4, %s297_s6), 1 }
   0xf   : > { %s258_s10 = smul.u32 6, %s345_s6 }
  0x11   : > { %s139_s13 = scalar_lea.vmem %s338_s0, %s258_s10  ;;  %s147_s16 = scalar_lea.vmem %s339_s1, %s258_s10 }
  0x12   : > { %v148_v0 = vld [vmem:[%s139_s13] sm:$0x3]  ;;  %v252_v1 = vld [vmem:[%s139_s13 + $0x2] sm:$0x3]  ;;  %v253_v2 = vld [vmem:[%s139_s13 + $0x4] sm:$0x3] }
  0x13   : > { %v153_v3 = vadd.f32 %v252_v1, %v148_v0 }
  0x15   : > { %v154_v4 = vadd.f32 %v253_v2, %v153_v3 }
  0x17   : > { %v155_v5 = vadd.f32 4.0, %v154_v4 }
  0x19   : > { %v156_v6 = vmax.f32 %v155_v5, 0.0 }
  0x1b   : > { %157 = vst [vmem:[%s147_s16] sm:$0x3] %v156_v6  ;;  %254 = vst [vmem:[%s147_s16 + $0x2] sm:$0x3] %v156_v6 }
  0x1c   : > { %255 = vst [vmem:[%s147_s16 + $0x4] sm:$0x3] %v156_v6 }
  0x1d PF: > { %s11_s8 = sadd.s32 1, %s305_s8   ;;  %s340_s6 = smov %s301_s7 }
  0x1e   : > { %p8_p5 = scmp.ge.s32.totalorder %s11_s8, 4   ;;  %s341_s7 = smov %s343_s9 }
  0x20   :  { %10 = sbr.rel (!%p8_p5) target bundleno = 2 (0x2), region = 58 }

</bundles_post_ra>
